<compile_context>
chip_gen: v5e
topology: v5e:2x2
jax: 0.10.0
libtpu: 0.0.40
codegen_flags: <defaults>
</compile_context>

<pallas_src>
import functools

import jax
import jax.numpy as jnp
from jax.experimental import pallas as pl
from jax.experimental.pallas import tpu as pltpu


def _round_up(n, m):
    return ((n + m - 1) // m) * m


def _mlp_kernel(xT_ref, w1_ref, b1_ref, w2_ref, b2_ref, oT_ref):
    # fc1 on the MXU: (H, I) @ (I, TB) -> (H, TB); batch on the lane axis.
    h = jnp.dot(w1_ref[...], xT_ref[...], preferred_element_type=jnp.float32)
    # bias (H, 1) broadcasts across lanes; ReLU on the VPU.
    h = jnp.maximum(h + b1_ref[...], 0.0)
    # fc2 has output width 1: avoid a degenerate MXU matmul, use a VPU multiply
    # followed by a sublane reduction over the hidden axis.
    out = jnp.sum(h * w2_ref[...], axis=0, keepdims=True)        # (1, TB)
    oT_ref[...] = (out + b2_ref[0, 0]).astype(oT_ref.dtype)


@functools.partial(jax.jit, static_argnames=("block_batch",))
def timing_offset_model(x, w1, b1, w2, b2, *, block_batch=1024):
    """Forward pass: relu(x @ w1.T + b1.T) @ w2 + b2.

    x : (B, input_size) f32  ->  (B, 1) f32
    """
    B, I = x.shape
    H = w1.shape[0]

    # Lane-dense batch tile: multiple of 128, no bigger than (padded) B.
    tb = max(128, min(int(block_batch), _round_up(B, 128)))
    tb = _round_up(tb, 128)
    Bp = _round_up(B, tb)

    # Layout plumbing in the wrapper: present a lane-dense (I, Bp) slab.
    xT = x.T
    if Bp != B:
        xT = jnp.pad(xT, ((0, 0), (0, Bp - B)))

    grid = (Bp // tb,)

    flops = 2 * Bp * (I * H + H)
    bytes_accessed = (Bp * I + Bp) * 4 + (H * I + 2 * H + 1) * 4

    oT = pl.pallas_call(
        _mlp_kernel,
        out_shape=jax.ShapeDtypeStruct((1, Bp), jnp.float32),
        grid=grid,
        in_specs=[
            pl.BlockSpec((I, tb), lambda i: (0, i)),   # x^T tile, streamed/pipelined
            pl.BlockSpec((H, I), lambda i: (0, 0)),    # W1 resident in VMEM
            pl.BlockSpec((H, 1), lambda i: (0, 0)),    # b1 resident in VMEM
            pl.BlockSpec((H, 1), lambda i: (0, 0)),    # w2 column resident in VMEM
            pl.BlockSpec(memory_space=pltpu.SMEM),     # b2 scalar in SMEM
        ],
        out_specs=pl.BlockSpec((1, tb), lambda i: (0, i)),
        compiler_params=pltpu.CompilerParams(
            dimension_semantics=("parallel",),
        ),
        cost_estimate=pl.CostEstimate(
            flops=flops, transcendentals=0, bytes_accessed=bytes_accessed),
    )(xT, w1, b1, w2, b2)

    # Back to the module's (B, 1) output layout.
    return oT[:, :B].T


def init_params(key, input_size, hidden_size):
    """Deterministic init matching PyTorch nn.Linear layouts/ranges."""
    k1, k2, k3, k4 = jax.random.split(key, 4)
    lim1 = 1.0 / (input_size ** 0.5)
    lim2 = 1.0 / (hidden_size ** 0.5)
    w1 = jax.random.uniform(k1, (hidden_size, input_size), jnp.float32, -lim1, lim1)
    b1 = jax.random.uniform(k2, (hidden_size, 1), jnp.float32, -lim1, lim1)
    w2 = jax.random.uniform(k3, (hidden_size, 1), jnp.float32, -lim2, lim2)
    b2 = jax.random.uniform(k4, (1, 1), jnp.float32, -lim2, lim2)
    return w1, b1, w2, b2


def _reference(x, w1, b1, w2, b2):
    return jnp.maximum(x @ w1.T + b1.T, 0.0) @ w2 + b2


if __name__ == "__main__":
    input_size, hidden_size = 16, 32

    key = jax.random.PRNGKey(0)
    kx, kp, kx2 = jax.random.split(key, 3)
    w1, b1, w2, b2 = init_params(kp, input_size, hidden_size)

    # Small batch (single grid step, padded to one 128-wide lane tile).
    x = jax.random.normal(kx, (8, input_size), dtype=jnp.float32)
    out = jax.block_until_ready(timing_offset_model(x, w1, b1, w2, b2))
    ref = _reference(x, w1, b1, w2, b2)
    assert out.shape == (8, 1)
    assert jnp.allclose(out, ref, atol=1e-4, rtol=1e-4)

    # Larger, non-multiple batch: exercises the multi-step grid + padding path.
    x2 = jax.random.normal(kx2, (1000, input_size), dtype=jnp.float32)
    out2 = jax.block_until_ready(
        timing_offset_model(x2, w1, b1, w2, b2, block_batch=256))
    ref2 = _reference(x2, w1, b1, w2, b2)
    assert out2.shape == (1000, 1)
    assert jnp.allclose(out2, ref2, atol=1e-4, rtol=1e-4)

    print("KERNEL_OK")
</pallas_src>

<mosaic_0001>
module attributes {stable_mosaic.version = 11 : i64} {
  func.func @_mlp_kernel(%arg0: i32, %arg1: memref<16x128xf32, #tpu.memory_space<vmem>>, %arg2: memref<32x16xf32, #tpu.memory_space<vmem>>, %arg3: memref<32x1xf32, #tpu.memory_space<vmem>>, %arg4: memref<32x1xf32, #tpu.memory_space<vmem>>, %arg5: memref<1x1xf32, #tpu.memory_space<smem>>, %arg6: memref<1x128xf32, #tpu.memory_space<vmem>>) attributes {dimension_semantics = [#tpu.dimension_semantics<parallel>], iteration_bounds = array<i64: 1>, scalar_prefetch = 0 : i64, scratch_operands = 0 : i64, tpu.core_type = #tpu.core_type<tc>, window_params = [{transform_indices = @transform_0, window_bounds = array<i64: 16, 128>}, {pipeline_mode = #tpu.pipeline_mode<synchronous>, transform_indices = @transform_1, window_bounds = array<i64: 32, 16>}, {pipeline_mode = #tpu.pipeline_mode<synchronous>, transform_indices = @transform_2, window_bounds = array<i64: 32, 1>}, {pipeline_mode = #tpu.pipeline_mode<synchronous>, transform_indices = @transform_3, window_bounds = array<i64: 32, 1>}, {transform_indices = @transform_4, window_bounds = array<i64: 1, 1>}, {transform_indices = @transform_5, window_bounds = array<i64: 1, 128>}]} {
    %c0 = arith.constant 0 : index
    %c0_0 = arith.constant 0 : index
    %0 = vector.load %arg2[%c0, %c0_0] : memref<32x16xf32, #tpu.memory_space<vmem>>, vector<32x16xf32>
    %c0_1 = arith.constant 0 : index
    %c0_2 = arith.constant 0 : index
    %1 = vector.load %arg1[%c0_1, %c0_2] : memref<16x128xf32, #tpu.memory_space<vmem>>, vector<16x128xf32>
    %cst = arith.constant dense<0.000000e+00> : vector<32x128xf32>
    %2 = tpu.matmul %0, %1, %cst {dimension_numbers = #tpu.dot_dimension_numbers<[1], [0], [0], [1], [0, 0, 1, 1], [], []>} : vector<32x16xf32>, vector<16x128xf32>, vector<32x128xf32> -> vector<32x128xf32>
    %c0_3 = arith.constant 0 : index
    %c0_4 = arith.constant 0 : index
    %3 = vector.load %arg3[%c0_3, %c0_4] : memref<32x1xf32, #tpu.memory_space<vmem>>, vector<32x1xf32>
    %4 = vector.broadcast %3 : vector<32x1xf32> to vector<32x128xf32>
    %5 = arith.addf %2, %4 : vector<32x128xf32>
    %cst_5 = arith.constant 0.000000e+00 : f32
    %6 = vector.broadcast %cst_5 : f32 to vector<32x128xf32>
    %7 = arith.maximumf %5, %6 : vector<32x128xf32>
    %c0_6 = arith.constant 0 : index
    %c0_7 = arith.constant 0 : index
    %8 = vector.load %arg4[%c0_6, %c0_7] : memref<32x1xf32, #tpu.memory_space<vmem>>, vector<32x1xf32>
    %9 = vector.broadcast %8 : vector<32x1xf32> to vector<32x128xf32>
    %10 = arith.mulf %7, %9 : vector<32x128xf32>
    %cst_8 = arith.constant dense<0.000000e+00> : vector<128xf32>
    %11 = vector.multi_reduction <add>, %10, %cst_8 [0] : vector<32x128xf32> to vector<128xf32>
    %12 = vector.shape_cast %11 : vector<128xf32> to vector<1x128xf32>
    %c0_9 = arith.constant 0 : index
    %c0_10 = arith.constant 0 : index
    %13 = memref.load %arg5[%c0_9, %c0_10] : memref<1x1xf32, #tpu.memory_space<smem>>
    %14 = vector.broadcast %13 : f32 to vector<1x128xf32>
    %15 = arith.addf %12, %14 : vector<1x128xf32>
    %c0_11 = arith.constant 0 : index
    %c0_12 = arith.constant 0 : index
    %16 = vector.load %arg6[%c0_11, %c0_12] : memref<1x128xf32, #tpu.memory_space<vmem>>, vector<1x128xf32>
    tpu.vector_store %arg6[%c0_11, %c0_12], %15 {strides = array<i32>} : memref<1x128xf32, #tpu.memory_space<vmem>>, vector<1x128xf32>,
    return
  }
  func.func @transform_0(%arg0: i32) -> (i32, i32) {
    %c0_i32 = arith.constant 0 : i32
    %c0_i32_0 = arith.constant 0 : i32
    return %c0_i32, %arg0 : i32, i32
  }
  func.func @transform_1(%arg0: i32) -> (i32, i32) {
    %c0_i32 = arith.constant 0 : i32
    %c0_i32_0 = arith.constant 0 : i32
    %c0_i32_1 = arith.constant 0 : i32
    return %c0_i32, %c0_i32_0 : i32, i32
  }
  func.func @transform_2(%arg0: i32) -> (i32, i32) {
    %c0_i32 = arith.constant 0 : i32
    %c0_i32_0 = arith.constant 0 : i32
    %c0_i32_1 = arith.constant 0 : i32
    return %c0_i32, %c0_i32_0 : i32, i32
  }
  func.func @transform_3(%arg0: i32) -> (i32, i32) {
    %c0_i32 = arith.constant 0 : i32
    %c0_i32_0 = arith.constant 0 : i32
    %c0_i32_1 = arith.constant 0 : i32
    return %c0_i32, %c0_i32_0 : i32, i32
  }
  func.func @transform_4(%arg0: i32) -> (i32, i32) {
    %c0_i32 = arith.constant 0 : i32
    %c0_i32_0 = arith.constant 0 : i32
    %c0_i32_1 = arith.constant 0 : i32
    return %c0_i32, %c0_i32_0 : i32, i32
  }
  func.func @transform_5(%arg0: i32) -> (i32, i32) {
    %c0_i32 = arith.constant 0 : i32
    %c0_i32_0 = arith.constant 0 : i32
    return %c0_i32, %arg0 : i32, i32
  }
}

</mosaic_0001>

<bundles_post_ra>
// kernel: timing_offset_model.1
= control target key start
LH: loop header
LB: loop body
LE: loop exit
PB: predicated region body
PF: predicated region fallthrough
CT: control target
= control target key end

     0   :  { %v156_v0 = vmov 0   ;;  %vm51_vm0 = vcmask 130048   ;;  %s235_s2 = inlined_call_operand.vmem [shape: f32[32,1], index: 2, kind: input, shape index: {}]   ;;  %s236_s0 = inlined_call_operand.vmem [shape: f32[16,128], index: 0, kind: input, shape index: {}]   ;;  %s237_s1 = inlined_call_operand.vmem [shape: f32[32,16], index: 1, kind: input, shape index: {}]   ;;  %s238_s3 = inlined_call_operand.vmem [shape: f32[32,1], index: 3, kind: input, shape index: {}]   ;;  %s239_s4 = inlined_call_operand.<no memory space> [shape: f32[1,1], index: 4, kind: input, shape index: {}]   ;;  %s240_s5 = inlined_call_operand.vmem [shape: f32[1,128], index: 5, kind: output, shape index: {}]  }
   0x1   :  { %154 = vset.pattern.permute.xlu1 %v156_v0  ;;  %153 = vset.pattern.permute.xlu0 %v156_v0  ;;  %v29_v1 = vld [vmem:[%s235_s2 + $0x10] sm:$0xff]  ;;  %v27_v2 = vld [vmem:[%s235_s2] sm:$0xff]  ;;  %v26_v3 = vld [vmem:[%s236_s0 + $0x8] sm:$0xff]  ;;  %v135_v47 = vstv %s239_s4 }
   0x2   :  { %43 = vperm.xlu1 %154, %v29_v1   ;;  %33 = vperm.xlu0 %153, %v27_v2   ;;  %v25_v4 = vld [vmem:[%s236_s0] sm:$0xff]  ;;  %v22_v6 = vld [vmem:[%s237_s1 + $0x8] sm:$0xff]  ;;  %v23_v7 = vld [vmem:[%s237_s1 + $0x10] sm:$0xff] }
   0x3   :  { %78 = vmatpush.msra.mxu0 %v26_v3  ;;  %146 = vmatpush.msra.mxu1 %v26_v3  ;;  %v21_v5 = vld [vmem:[%s237_s1] sm:$0xff]  ;;  %v24_v8 = vld [vmem:[%s237_s1 + $0x18] sm:$0xff]  ;;  %v28_v10 = vld [vmem:[%s235_s2 + $0x8] sm:$0xff] }
   0x4   :  { %147 = vmatpush.msra.mxu2 %v26_v3  ;;  %148 = vmatpush.msra.mxu3 %v26_v3  ;;  %v30_v9 = vld [vmem:[%s235_s2 + $0x18] sm:$0xff]  ;;  %v97_v11 = vld [vmem:[%s238_s3] sm:$0xff]  ;;  %v99_v13 = vld [vmem:[%s238_s3 + $0x10] sm:$0xff] }
   0x5   :  { %79 = vmatpush.msra.mxu0 %v25_v4  ;;  %149 = vmatpush.msra.mxu1 %v25_v4  ;;  %v100_v12 = vld [vmem:[%s238_s3 + $0x18] sm:$0xff]  ;;  %v98_v14 = vld [vmem:[%s238_s3 + $0x8] sm:$0xff] }
   0x6   :  { %150 = vmatpush.msra.mxu2 %v25_v4  ;;  %151 = vmatpush.msra.mxu3 %v25_v4 }
   0x7   :  { %142 = vmatmul.msk.f32.vlgmr.msra.gmra.mxu0 %vm51_vm0, %v21_v5  ;;  %143 = vmatmul.msk.f32.vlgmr.msra.gmra.mxu1 %vm51_vm0, %v22_v6 }
   0x8   :  { %144 = vmatmul.msk.f32.vlgmr.msra.gmra.mxu2 %vm51_vm0, %v23_v7  ;;  %145 = vmatmul.msk.f32.vlgmr.msra.gmra.mxu3 %vm51_vm0, %v24_v8 }
   0x9   :  { %155 = vset.pattern.permute.xlu2 %v156_v0 }
   0xa   :  { %48 = vperm.xlu1 %154, %v30_v9   ;;  %38 = vperm.xlu0 %153, %v28_v10  }
   0xb   :  { %103 = vperm.xlu2 %155, %v97_v11  }
  0x12   :  { %118 = vperm.xlu1 %154, %v100_v12   ;;  %113 = vperm.xlu0 %153, %v99_v13  }
  0x13   :  { %108 = vperm.xlu2 %155, %v98_v14  }
  0x65   :  { %v104_v17 = vpop.permute.xlu2 %103 }
  0x6d   :  { %v109_v26 = vpop.permute.xlu2 %108 }
  0x74   :  { %v34_v15 = vpop.permute.xlu0 %33  ;;  %v44_v16 = vpop.permute.xlu1 %43 }
  0x7c   :  { %v39_v18 = vpop.permute.xlu0 %38  ;;  %v49_v23 = vpop.permute.xlu1 %48 }
  0x84   :  { %v81_v19 = vpop.f32.mrf.mxu0  ;;  %v84_v20 = vpop.f32.mrf.mxu1 }
  0x85   :  { %v82_v21 = vadd.f32 %v81_v19, %v34_v15  ;;  %v85_v22 = vadd.f32 %v84_v20, %v39_v18  ;;  %v114_v35 = vpop.permute.xlu0 %113  ;;  %v119_v38 = vpop.permute.xlu1 %118 }
  0x87   :  { %v93_v24 = vmax.f32 %v82_v21, 0.0  ;;  %v94_v25 = vmax.f32 %v85_v22, 0.0 }
  0x89   :  { %v121_v29 = vmul.f32 %v104_v17, %v93_v24  ;;  %v122_v30 = vmul.f32 %v109_v26, %v94_v25 }
  0x8b   :  { %v87_v27 = vpop.f32.mrf.mxu2  ;;  %v90_v28 = vpop.f32.mrf.mxu3  ;;  %v125_v36 = vadd.f32 %v122_v30, %v121_v29 }
  0x8c   :  { %v88_v31 = vadd.f32 %v87_v27, %v44_v16  ;;  %v91_v32 = vadd.f32 %v90_v28, %v49_v23 }
  0x8e   :  { %v95_v33 = vmax.f32 %v88_v31, 0.0  ;;  %v96_v34 = vmax.f32 %v91_v32, 0.0 }
  0x90   :  { %v123_v37 = vmul.f32 %v114_v35, %v95_v33  ;;  %v124_v40 = vmul.f32 %v119_v38, %v96_v34 }
  0x92   :  { %v126_v39 = vadd.f32 %v125_v36, %v123_v37 }
  0x94   :  { %v127_v41 = vadd.f32 %v126_v39, %v124_v40 }
  0x96   :  { %v128_v42 = vrot.slane %v127_v41, 4 }
  0x98   :  { %v129_v43 = vadd.f32 %v128_v42, %v127_v41 }
  0x9a   :  { %v130_v44 = vrot.slane %v129_v43, 2 }
  0x9c   :  { %v131_v45 = vadd.f32 %v130_v44, %v129_v43 }
  0x9e   :  { %v132_v46 = vrot.slane %v131_v45, 1 }
  0xa0   :  { %v133_v48 = vadd.f32 %v132_v46, %v131_v45 }
  0xa2   :  { %v136_v49 = vadd.f32 %v135_v47, %v133_v48 }
  0xa4   :  { %137 = vst [vmem:[%s240_s5] sm:$0x1] %v136_v49 }

</bundles_post_ra>
